<compile_context>
chip_gen: v7x
topology: tpu7x:2x2x1
jax: 0.10.0
libtpu: 0.0.40
codegen_flags: <defaults>
</compile_context>

<pallas_src>
import numpy as np
import jax
import jax.numpy as jnp
from jax.experimental import pallas as pl
from jax.experimental.pallas import tpu as pltpu


_HALF_LOG_2PI = 0.5 * float(np.log(2.0 * np.pi))


# ----------------------------- Pallas kernel -----------------------------
def _gaussian_ac_kernel(
    xin_ref,      # (TB, A+S+1)  [noise | obs | 1]   (batch-streamed)
    wbody_ref,    # (A+S+1, 2H)  [0 ; wa‖wc ; ba‖bc] (resident)
    whead_ref,    # (2H, A+1)    block-diagonal [wm ; wv] (resident)
    bhead_ref,    # (1, A+1)     [bm | bv]
    std_ref,      # (1, A)
    lpc_ref,      # (1, 1)       -sum(log std) - 0.5*A*log(2*pi)
    out_ref,      # out (TB, A+2)  [action | log_prob | v]
):
    a_dim = std_ref.shape[1]

    x = xin_ref[...]                                   # f32 slab
    noise = x[:, :a_dim]                               # f32 path for sample/log_prob

    mm_dtype = wbody_ref.dtype                         # bf16 (or f32) MXU operands
    # Fused actor+critic body: one matmul over the whole slab. Noise rows of
    # Wbody are zero; the ones-column row carries the body bias.
    phi = jnp.tanh(
        jnp.dot(x.astype(mm_dtype), wbody_ref[...],
                preferred_element_type=jnp.float32)
    )                                                  # (TB, 2H) f32

    # Fused block-diagonal head: cols [:A] use phi_a only (actor mean pre-tanh),
    # col A uses phi_v only (critic value).
    head = jnp.dot(phi.astype(mm_dtype), whead_ref[...],
                   preferred_element_type=jnp.float32) + bhead_ref[...]
    mean = jnp.tanh(head[:, :a_dim])
    v = head[:, a_dim:a_dim + 1]

    action = mean + std_ref[...] * noise               # dist.sample()

    # log N(action; mean, std) summed over A, with action-mean == std*noise:
    #   -0.5*sum(noise^2) + ( -sum(log std) - 0.5*A*log(2*pi) )   [host constant]
    log_prob = -0.5 * jnp.sum(noise * noise, axis=1, keepdims=True) + lpc_ref[...]

    # Single fused output slab -> one writeback stream per tile.
    out_ref[:, :a_dim] = action
    out_ref[:, a_dim:a_dim + 1] = log_prob
    out_ref[:, a_dim + 1:a_dim + 2] = v


# ----------------------------- host-side packing -----------------------------
def _pack_params(params, compute_dtype):
    """Pack per-layer params into the fused slabs the kernel expects."""
    S, H = params["wa"].shape
    A = params["wm"].shape[1]
    f32 = jnp.float32

    w_obs = jnp.concatenate([params["wa"], params["wc"]], axis=1)          # (S, 2H)
    b_body = jnp.concatenate([params["ba"], params["bc"]], axis=1)         # (1, 2H)
    wbody = jnp.concatenate(
        [jnp.zeros((A, 2 * H), f32),   # noise lanes contribute nothing
         w_obs,                        # obs lanes
         b_body],                      # ones-column row == folded body bias
        axis=0,
    ).astype(compute_dtype)                                                # (A+S+1, 2H)

    whead = jnp.zeros((2 * H, A + 1), f32)
    whead = whead.at[:H, :A].set(params["wm"])
    whead = whead.at[H:, A:].set(params["wv"])
    whead = whead.astype(compute_dtype)                                    # (2H, A+1)

    b_head = jnp.concatenate([params["bm"], params["bv"]], axis=1)         # (1, A+1)
    std = params["std"]                                                    # (1, A)
    # TODO(synk): std is used raw (matches this module's torch.distributions.Normal(mean, std));
    # variants with softplus/exp(log_std) would need that applied here instead.
    lpc = (-jnp.sum(jnp.log(std)) - A * _HALF_LOG_2PI).reshape(1, 1)       # (1, 1)
    return wbody, whead, b_head, std, lpc


def gaussian_actor_critic_forward(obs, params, noise, *, batch_tile=1024,
                                  compute_dtype=jnp.bfloat16):
    """GaussianActorCriticNet forward in one Pallas call.

    Returns (action, log_prob, entropy_placeholder, v) matching the PyTorch module.
    """
    obs = jnp.asarray(obs, jnp.float32)
    noise = jnp.asarray(noise, jnp.float32)
    B, S = obs.shape
    H = params["wa"].shape[1]
    A = params["wm"].shape[1]
    SW = A + S + 1

    wbody, whead, b_head, std, lpc = _pack_params(params, compute_dtype)

    # Batch tiling: always tile (never a whole-huge-batch block). Pad B up to a
    # multiple of the tile and slice outputs afterwards. Keeps per-block VMEM
    # tiny on every generation (incl. v7x's 64 MiB) and keeps the grid pipelined.
    tile = max(8, (int(batch_tile) // 8) * 8)
    TB = ((B + 7) // 8) * 8 if B <= tile else tile
    Bp = ((B + TB - 1) // TB) * TB
    grid = (Bp // TB,)

    xin = jnp.concatenate([noise, obs, jnp.ones((B, 1), jnp.float32)], axis=1)  # (B, SW)
    if Bp != B:
        xin = jnp.pad(xin, ((0, Bp - B), (0, 0)))

    out = pl.pallas_call(
        _gaussian_ac_kernel,
        out_shape=jax.ShapeDtypeStruct((Bp, A + 2), jnp.float32),
        grid=grid,
        in_specs=[
            pl.BlockSpec((TB, SW), lambda i: (i, 0)),          # [noise|obs|1] batch stream
            pl.BlockSpec((SW, 2 * H), lambda i: (0, 0)),       # fused body weight (resident)
            pl.BlockSpec((2 * H, A + 1), lambda i: (0, 0)),    # fused head weight (resident)
            pl.BlockSpec((1, A + 1), lambda i: (0, 0)),        # head bias
            pl.BlockSpec((1, A), lambda i: (0, 0)),            # std
            pl.BlockSpec((1, 1), lambda i: (0, 0)),            # log-prob constant
        ],
        out_specs=pl.BlockSpec((TB, A + 2), lambda i: (i, 0)), # [action|log_prob|v]
        compiler_params=pltpu.CompilerParams(
            # Batch axis is embarrassingly parallel (megacore sharding on v7x).
            # TODO(synk): profile on v7x; if "parallel" alone doesn't split the grid
            # across both TensorCores, switch to pltpu.CORE_PARALLEL / core_map.
            # If profiles show exposed DMA waits, add pipeline_mode=pl.Buffered(3)
            # on the batch-streamed specs.
            dimension_semantics=("parallel",),
        ),
    )(xin, wbody, whead, b_head, std, lpc)

    action = out[:B, :A]
    log_prob = out[:B, A:A + 1]
    v = out[:B, A + 1:A + 2]
    entropy = jnp.zeros((B, 1), jnp.float32)  # matches tensor(np.zeros((B, 1)))
    return action, log_prob, entropy, v


# ----------------------------- parameter init -----------------------------
def init_params(key, state_dim, hidden, action_dim):
    """Deterministic init mirroring layer_init (orthogonal weights, zero bias)."""
    k1, k2, k3, k4 = jax.random.split(key, 4)
    orth = jax.nn.initializers.orthogonal()
    # stored as (in, out) so the kernel computes x @ W directly
    wa = orth(k1, (state_dim, hidden), jnp.float32)              # actor body
    wc = orth(k2, (state_dim, hidden), jnp.float32)              # critic body
    wm = orth(k3, (hidden, action_dim), jnp.float32) * 0.001     # fc_action, w_scale=1e-3
    wv = orth(k4, (hidden, 1), jnp.float32) * 0.001              # fc_critic, w_scale=1e-3
    return {
        "wa": wa, "ba": jnp.zeros((1, hidden), jnp.float32),
        "wc": wc, "bc": jnp.zeros((1, hidden), jnp.float32),
        "wm": wm, "bm": jnp.zeros((1, action_dim), jnp.float32),
        "wv": wv, "bv": jnp.zeros((1, 1), jnp.float32),
        "std": jnp.ones((1, action_dim), jnp.float32),           # nn.Parameter(torch.ones(1, A))
    }


# ----------------------------- reference (plain JAX) -----------------------------
def _reference(obs, p, noise):
    phi_a = jnp.tanh(obs @ p["wa"] + p["ba"])
    phi_v = jnp.tanh(obs @ p["wc"] + p["bc"])
    mean = jnp.tanh(phi_a @ p["wm"] + p["bm"])
    v = phi_v @ p["wv"] + p["bv"]
    std = p["std"]
    action = mean + std * noise
    logp = -((action - mean) ** 2) / (2 * std * std) - jnp.log(std) - 0.5 * jnp.log(2 * jnp.pi)
    logp = jnp.sum(logp, axis=1, keepdims=True)
    return action, logp, jnp.zeros_like(logp), v


if __name__ == "__main__":
    B, STATE_DIM, HIDDEN, ACTION_DIM = 8, 16, 32, 4

    key = jax.random.PRNGKey(0)
    k_obs, k_params, k_noise = jax.random.split(key, 3)

    obs = jax.random.normal(k_obs, (B, STATE_DIM), jnp.float32)
    params = init_params(k_params, STATE_DIM, HIDDEN, ACTION_DIM)
    # dist.sample() randomness generated host-side (deterministic) and consumed in-kernel
    # TODO(synk): could move sampling in-kernel via pltpu.prng_seed/stateful_normal,
    # but that changes the RNG stream vs. the deterministic reference check.
    noise = jax.random.normal(k_noise, (B, ACTION_DIM), jnp.float32)

    ref = _reference(obs, params, noise)

    # 1) default path: bf16 MXU operands, f32 accumulation / f32 noise+log_prob path
    out_bf16 = gaussian_actor_critic_forward(obs, params, noise)
    jax.block_until_ready(out_bf16)
    for got, want in zip(out_bf16, ref):
        np.testing.assert_allclose(np.asarray(got), np.asarray(want), rtol=1e-3, atol=1e-3)

    # 2) exact f32 matmul path
    out_f32 = gaussian_actor_critic_forward(obs, params, noise, compute_dtype=jnp.float32)
    jax.block_until_ready(out_f32)
    for got, want in zip(out_f32, ref):
        np.testing.assert_allclose(np.asarray(got), np.asarray(want), rtol=1e-5, atol=1e-5)

    # 3) multi-tile path with batch padding (B not a multiple of the tile)
    B2 = 40
    obs2 = jax.random.normal(k_obs, (B2, STATE_DIM), jnp.float32)
    noise2 = jax.random.normal(k_noise, (B2, ACTION_DIM), jnp.float32)
    out_tiled = gaussian_actor_critic_forward(obs2, params, noise2, batch_tile=16,
                                              compute_dtype=jnp.float32)
    jax.block_until_ready(out_tiled)
    ref2 = _reference(obs2, params, noise2)
    for got, want in zip(out_tiled, ref2):
        np.testing.assert_allclose(np.asarray(got), np.asarray(want), rtol=1e-5, atol=1e-5)

    action, log_prob, ent, v = out_bf16
    assert action.shape == (B, ACTION_DIM)
    assert log_prob.shape == (B, 1) and ent.shape == (B, 1) and v.shape == (B, 1)
    print("KERNEL_OK")
</pallas_src>

<mosaic_0001>
module attributes {stable_mosaic.version = 11 : i64} {
  func.func @_gaussian_ac_kernel(%arg0: i32, %arg1: memref<8x21xf32, #tpu.memory_space<vmem>>, %arg2: memref<21x64xbf16, #tpu.memory_space<vmem>>, %arg3: memref<64x5xbf16, #tpu.memory_space<vmem>>, %arg4: memref<1x5xf32, #tpu.memory_space<vmem>>, %arg5: memref<1x4xf32, #tpu.memory_space<vmem>>, %arg6: memref<1x1xf32, #tpu.memory_space<vmem>>, %arg7: memref<8x6xf32, #tpu.memory_space<vmem>>) attributes {dimension_semantics = [#tpu.dimension_semantics<parallel>], iteration_bounds = array<i64: 1>, scalar_prefetch = 0 : i64, scratch_operands = 0 : i64, tpu.core_type = #tpu.core_type<tc>, window_params = [{transform_indices = @transform_0, window_bounds = array<i64: 8, 21>}, {pipeline_mode = #tpu.pipeline_mode<synchronous>, transform_indices = @transform_1, window_bounds = array<i64: 21, 64>}, {pipeline_mode = #tpu.pipeline_mode<synchronous>, transform_indices = @transform_2, window_bounds = array<i64: 64, 5>}, {pipeline_mode = #tpu.pipeline_mode<synchronous>, transform_indices = @transform_3, window_bounds = array<i64: 1, 5>}, {pipeline_mode = #tpu.pipeline_mode<synchronous>, transform_indices = @transform_4, window_bounds = array<i64: 1, 4>}, {pipeline_mode = #tpu.pipeline_mode<synchronous>, transform_indices = @transform_5, window_bounds = array<i64: 1, 1>}, {transform_indices = @transform_6, window_bounds = array<i64: 8, 6>}]} {
    %c0 = arith.constant 0 : index
    %c0_0 = arith.constant 0 : index
    %0 = vector.load %arg1[%c0, %c0_0] : memref<8x21xf32, #tpu.memory_space<vmem>>, vector<8x21xf32>
    %1 = vector.extract_strided_slice %0 {offsets = [0, 0], sizes = [8, 4], strides = [1, 1]} : vector<8x21xf32> to vector<8x4xf32>
    %2 = arith.truncf %0 : vector<8x21xf32> to vector<8x21xbf16>
    %c0_1 = arith.constant 0 : index
    %c0_2 = arith.constant 0 : index
    %3 = vector.load %arg2[%c0_1, %c0_2] : memref<21x64xbf16, #tpu.memory_space<vmem>>, vector<21x64xbf16>
    %cst = arith.constant dense<0.000000e+00> : vector<8x64xf32>
    %4 = tpu.matmul %2, %3, %cst {dimension_numbers = #tpu.dot_dimension_numbers<[1], [0], [0], [1], [0, 0, 1, 1], [], []>} : vector<8x21xbf16>, vector<21x64xbf16>, vector<8x64xf32> -> vector<8x64xf32>
    %5 = math.tanh %4 : vector<8x64xf32>
    %6 = arith.truncf %5 : vector<8x64xf32> to vector<8x64xbf16>
    %c0_3 = arith.constant 0 : index
    %c0_4 = arith.constant 0 : index
    %7 = vector.load %arg3[%c0_3, %c0_4] : memref<64x5xbf16, #tpu.memory_space<vmem>>, vector<64x5xbf16>
    %cst_5 = arith.constant dense<0.000000e+00> : vector<8x5xf32>
    %8 = tpu.matmul %6, %7, %cst_5 {dimension_numbers = #tpu.dot_dimension_numbers<[1], [0], [0], [1], [0, 0, 1, 1], [], []>} : vector<8x64xbf16>, vector<64x5xbf16>, vector<8x5xf32> -> vector<8x5xf32>
    %c0_6 = arith.constant 0 : index
    %c0_7 = arith.constant 0 : index
    %9 = vector.load %arg4[%c0_6, %c0_7] : memref<1x5xf32, #tpu.memory_space<vmem>>, vector<1x5xf32>
    %10 = vector.broadcast %9 : vector<1x5xf32> to vector<8x5xf32>
    %11 = arith.addf %8, %10 : vector<8x5xf32>
    %12 = vector.extract_strided_slice %11 {offsets = [0, 0], sizes = [8, 4], strides = [1, 1]} : vector<8x5xf32> to vector<8x4xf32>
    %13 = math.tanh %12 : vector<8x4xf32>
    %14 = vector.extract_strided_slice %11 {offsets = [0, 4], sizes = [8, 1], strides = [1, 1]} : vector<8x5xf32> to vector<8x1xf32>
    %c0_8 = arith.constant 0 : index
    %c0_9 = arith.constant 0 : index
    %15 = vector.load %arg5[%c0_8, %c0_9] : memref<1x4xf32, #tpu.memory_space<vmem>>, vector<1x4xf32>
    %16 = vector.broadcast %15 : vector<1x4xf32> to vector<8x4xf32>
    %17 = arith.mulf %16, %1 : vector<8x4xf32>
    %18 = arith.addf %13, %17 : vector<8x4xf32>
    %19 = arith.mulf %1, %1 : vector<8x4xf32>
    %cst_10 = arith.constant dense<0.000000e+00> : vector<8xf32>
    %20 = vector.multi_reduction <add>, %19, %cst_10 [1] : vector<8x4xf32> to vector<8xf32>
    %21 = vector.shape_cast %20 : vector<8xf32> to vector<8x1xf32>
    %cst_11 = arith.constant -5.000000e-01 : f32
    %22 = vector.broadcast %cst_11 : f32 to vector<8x1xf32>
    %23 = arith.mulf %22, %21 : vector<8x1xf32>
    %c0_12 = arith.constant 0 : index
    %c0_13 = arith.constant 0 : index
    %24 = vector.load %arg6[%c0_12, %c0_13] : memref<1x1xf32, #tpu.memory_space<vmem>>, vector<1x1xf32>
    %25 = vector.broadcast %24 : vector<1x1xf32> to vector<8x1xf32>
    %26 = arith.addf %23, %25 : vector<8x1xf32>
    %c0_14 = arith.constant 0 : index
    %c0_15 = arith.constant 0 : index
    %27 = vector.load %arg7[%c0_14, %c0_15] : memref<8x6xf32, #tpu.memory_space<vmem>>, vector<8x4xf32>
    tpu.vector_store %arg7[%c0_14, %c0_15], %18 {strides = array<i32>} : memref<8x6xf32, #tpu.memory_space<vmem>>, vector<8x4xf32>,
    %c0_16 = arith.constant 0 : index
    %c4 = arith.constant 4 : index
    %28 = vector.load %arg7[%c0_16, %c4] : memref<8x6xf32, #tpu.memory_space<vmem>>, vector<8x1xf32>
    tpu.vector_store %arg7[%c0_16, %c4], %26 {strides = array<i32>} : memref<8x6xf32, #tpu.memory_space<vmem>>, vector<8x1xf32>,
    %c0_17 = arith.constant 0 : index
    %c5 = arith.constant 5 : index
    %29 = vector.load %arg7[%c0_17, %c5] : memref<8x6xf32, #tpu.memory_space<vmem>>, vector<8x1xf32>
    tpu.vector_store %arg7[%c0_17, %c5], %14 {strides = array<i32>} : memref<8x6xf32, #tpu.memory_space<vmem>>, vector<8x1xf32>,
    return
  }
  func.func @transform_0(%arg0: i32) -> (i32, i32) {
    %c0_i32 = arith.constant 0 : i32
    %c0_i32_0 = arith.constant 0 : i32
    return %arg0, %c0_i32 : i32, i32
  }
  func.func @transform_1(%arg0: i32) -> (i32, i32) {
    %c0_i32 = arith.constant 0 : i32
    %c0_i32_0 = arith.constant 0 : i32
    %c0_i32_1 = arith.constant 0 : i32
    return %c0_i32, %c0_i32_0 : i32, i32
  }
  func.func @transform_2(%arg0: i32) -> (i32, i32) {
    %c0_i32 = arith.constant 0 : i32
    %c0_i32_0 = arith.constant 0 : i32
    %c0_i32_1 = arith.constant 0 : i32
    return %c0_i32, %c0_i32_0 : i32, i32
  }
  func.func @transform_3(%arg0: i32) -> (i32, i32) {
    %c0_i32 = arith.constant 0 : i32
    %c0_i32_0 = arith.constant 0 : i32
    %c0_i32_1 = arith.constant 0 : i32
    return %c0_i32, %c0_i32_0 : i32, i32
  }
  func.func @transform_4(%arg0: i32) -> (i32, i32) {
    %c0_i32 = arith.constant 0 : i32
    %c0_i32_0 = arith.constant 0 : i32
    %c0_i32_1 = arith.constant 0 : i32
    return %c0_i32, %c0_i32_0 : i32, i32
  }
  func.func @transform_5(%arg0: i32) -> (i32, i32) {
    %c0_i32 = arith.constant 0 : i32
    %c0_i32_0 = arith.constant 0 : i32
    %c0_i32_1 = arith.constant 0 : i32
    return %c0_i32, %c0_i32_0 : i32, i32
  }
  func.func @transform_6(%arg0: i32) -> (i32, i32) {
    %c0_i32 = arith.constant 0 : i32
    %c0_i32_0 = arith.constant 0 : i32
    return %arg0, %c0_i32 : i32, i32
  }
}

</mosaic_0001>

<bundles_post_ra>
// kernel: tpu_custom_call.1
= control target key start
LH: loop header
LB: loop body
LE: loop exit
PB: predicated region body
PF: predicated region fallthrough
CT: control target
= control target key end

     0   :  { %s392_s0 = inlined_call_operand.vmem [shape: f32[8,21], index: 0, kind: input, shape index: {}]   ;;  %s393_s1 = inlined_call_operand.vmem [shape: bf16[21,64], index: 1, kind: input, shape index: {}]   ;;  %s394_s2 = inlined_call_operand.vmem [shape: bf16[64,5], index: 2, kind: input, shape index: {}]   ;;  %s395_s3 = inlined_call_operand.vmem [shape: f32[1,5], index: 3, kind: input, shape index: {}]   ;;  %s396_s4 = inlined_call_operand.vmem [shape: f32[1,4], index: 4, kind: input, shape index: {}]   ;;  %s397_s5 = inlined_call_operand.<no memory space> [shape: f32[1,1], index: 5, kind: input, shape index: {}]   ;;  %s398_s6 = inlined_call_operand.hbm [shape: f32[8,6], index: 6, kind: output, shape index: {}]  }
   0x1   :  { %v11_v0 = vstv %s397_s5 }
   0x2   :  { %12 = vst [vmem:[#allocation2] sm:$0x1] %v11_v0 }
   0x3   :  { %v273_v1 = vld [vmem:[%s393_s1] sm:$0xff]   ;;  %v307_v2 = vmov 0.0   ;;  %v274_v3 = vld [vmem:[%s393_s1 + $0x8] ss:$0 sps:$4 sm:$0x77]   ;;  %vm45_vm0 = vcmask 1041408  }
   0x4   :  { %247 = vmatprep.subr.bf16.mxu0 %v307_v2  ;;  %255 = vmatprep.subr.bf16.mxu1 %v307_v2  ;;  %vm46_vm1 = vcmask 1042432   ;;  %v275_v4 = vld [vmem:[%s394_s2] sm:$0xff]   ;;  %v308_v5 = vmov 65535   ;;  %vm309_vm2 = vmmov 0  }
   0x5   :  { %248 = vmatpush3.bf16.msra.mxu0 %v273_v1  ;;  %v47_v6 = vsel %vm45_vm0, 4294967295, %v308_v5  ;;  %251 = vmatprep.mubr.msk.bf16.mxu0 %vm309_vm2, %v307_v2  ;;  %v27_v7 = vld [vmem:[%s392_s0] sm:$0xff] }
   0x6   :  { %249 = vmatprep.subr.bf16.mxu0 %v307_v2  ;;  %v48_v8 = vsel %vm46_vm1, %v47_v6, 0  ;;  %256 = vmatpush3.bf16.msra.mxu1 %v275_v4  ;;  %v28_v10 = vpack.c.bf16 %v27_v7, %v27_v7 }
   0x7   :  { %263 = vmatprep.mubr.msk.bf16.mxu1 %vm309_vm2, %v307_v2  ;;  %v50_v9 = vand.u32 %v274_v3, %v48_v8  ;;  %257 = vmatprep.subr.bf16.mxu1 %v307_v2 }
   0x8   :  { %13 = vsyncpa [#allocation4], 0  ;;  %vm41_vm3 = vcmask 171008   ;;  %v276_v11 = vld [vmem:[%s394_s2 + $0x8] sm:$0xff]   ;;  %v277_v12 = vld [vmem:[%s394_s2 + $0x10] sm:$0xff]   ;;  %v187_v14 = vmul.f32 %v27_v7, %v27_v7  ;;  %vm188_vm4 = vcmask 31744  }
   0x9   :  { %250 = vmatpush3.bf16.msra.mxu0 %v50_v9  ;;  %v278_v13 = vld [vmem:[%s394_s2 + $0x18] sm:$0xff]   ;;  %vm133_vm5 = vcmask 523264   ;;  %v238_v24 = vld [vmem:[#allocation2] ss:$0 sm:$0xff]  ;;  %s310_s2 = smov 4   ;;  %s311_s12 = smov 1  }
   0xa   :  { %258 = vmatpush3.bf16.msra.mxu1 %v276_v11  ;;  %v189_v15 = vsel %vm188_vm4, %v187_v14, 0.0  ;;  %v231_v26 = vld [vmem:[%s395_s3] ss:$0 sm:$0xff]  ;;  %vm206_vm6 = vcmask 39968   ;;  %s312_s3 = smov [#allocation3]   ;;  %vm212_vm7 = vcmask 48168  }
   0xb   :  { %259 = vmatprep.subr.bf16.mxu1 %v307_v2  ;;  %190 = vadd.xlane.f32.xlu0 %v189_v15  ;;  %v237_v32 = vld [vmem:[%s396_s4] ss:$0 sm:$0xff]  ;;  %s220_s15 = sshll.u32 %s312_s3, 4  ;;  %s221_s15 = int_to_ptr.vmem [resolvable:$true] %s220_s15 }
   0xc   :  { %252 = vmatmul.mubr.msk.bf16.vlgmr.msra.gmra.mrb[0].mxu0 %vm41_vm3, %v28_v10  ;;  %v185_v33 = vmul.f32 %v237_v32, %v27_v7  ;;  %s283_s16 = scalar_lea.vmem %s221_s15, 128  ;;  %p288_p1 = scmp.lt.s32.totalorder %s221_s15, %s221_s15 }
   0xd   :  { %p284_p0 = scmp.ne.s32.totalorder %s221_s15, %s283_s16  ;;  %p289_p2 = scmp.lt.s32.totalorder %s283_s16, %s283_s16 }
   0xe   :  { %260 = vmatpush3.bf16.msra.mxu1 %v277_v12 }
   0xf   :  { %261 = vmatprep.subr.bf16.mxu1 %v307_v2  ;;  %p290_p3 = por %p289_p2, %p288_p1 }
  0x11   :  { %p291_p4 = pnand %p290_p3, %p284_p0 }
  0x12   :  { %262 = vmatpush3.bf16.msra.mxu1 %v278_v13 }
  0x98   :  { %v191_v22 = vpop.xlane.xlu0 %190 }
  0x99   :  { %v192_v23 = vmul.f32 -0.5, %v191_v22 }
  0x9b   :  { %v200_v25 = vadd.f32 %v238_v24, %v192_v23 }
  0x9d   :  { %203 = vrot.lane.b32.xlu0 %v200_v25, %s310_s2 }
  0xdf   :  { %v86_v16 = vpop.f32.mrb[0].mxu0 }
  0xe0   :  { %279 = vtanh.f32 %v86_v16  ;;  %v253_v17 = vpop.f32.mrb[1].mxu0 }
  0xe1   :  { %v89_v18 = vpop.f32.mrb[2].mxu0 }
  0xe2   :  { %v254_v19 = vpop.f32.mrb[3].mxu0 }
  0xea   :  { %v280_v20 = vpop.eup %279 }
  0xeb   :  { %v93_v21 = vpack.c.bf16 %v280_v20, %v280_v20 }
  0xed   :  { %264 = vmatmul.mubr.msk.bf16.vlgmr.msra.gmra.mrb[0].mxu1 %vm133_vm5, %v93_v21 }
 0x10f   :  { %v204_v35 = vpop.permute.xlu0 %203 }
 0x1c0   :  { %v171_v27 = vpop.f32.mrb[0].mxu1 }
 0x1c1   :  { %v172_v28 = vadd.f32 %v231_v26, %v171_v27  ;;  %v265_v29 = vpop.f32.mrb[1].mxu1 }
 0x1c2   :  { %v174_v30 = vpop.f32.mrb[2].mxu1 }
 0x1c3   :  { %281 = vtanh.f32 %v172_v28  ;;  %209 = vrot.lane.b32.xlu1 %v172_v28, %s311_s12  ;;  %v266_v31 = vpop.f32.mrb[3].mxu1 }
 0x1cd   :  { %v282_v34 = vpop.eup %281 }
 0x1ce   :  { %v186_v36 = vadd.f32 %v282_v34, %v185_v33 }
 0x1d0   :  { %201 = vst.msk [vmem:[#allocation3] sm:$0xff] %vm188_vm4, %v186_v36 }
 0x1d1   :  { %207 = vst.msk [vmem:[#allocation3] sm:$0xff] %vm206_vm6, %v204_v35 }
 0x235   :  { %v210_v37 = vpop.permute.xlu1 %209 }
 0x236   :  { %213 = vst.msk [vmem:[#allocation3] sm:$0xff] %vm212_vm7, %v210_v37 }
 0x237   :  { %294 = shalt.err (!%p291_p4)
}
 0x238   :  { %s295_s18 = scalar_lea.hbm %s398_s6, 128 }
 0x239   :  { %p296_p5 = scmp.ne.s32.totalorder %s398_s6, %s295_s18  ;;  %p299_p6 = scmp.lt.u32.totalorder %s295_s18, %s398_s6 }
 0x23b   :  { %p301_p7 = pnand %p299_p6, %p296_p5 }
 0x23d   :  { %304 = shalt.err (!%p301_p7)
}
 0x23e   :  { %223 = dma.vmem_to_hbm [thread:$0]  %s221_s15, 128, %s398_s6, [#allocation4]  }
 0x23f   :  { %305 = dma.done.wait [#allocation4], 128  }
 0x240   :  { %306 = vsyncadd [#allocation4], 4294967168 }
 0x241   :  { %227 = vsyncpa [#allocation4], 1 }

</bundles_post_ra>
